<compile_context>
chip_gen: v6e
topology: v6e:2x2x1
jax: 0.10.0
libtpu: 0.0.40
codegen_flags: <defaults>
</compile_context>

<pallas_src>
import functools
import math

import jax
import jax.numpy as jnp
from jax.experimental import pallas as pl
from jax.experimental.pallas import tpu as pltpu


def _round_up(x, m):
    return ((x + m - 1) // m) * m


def _round_down(x, m):
    return (x // m) * m


def _freqs(half):
    emb = math.log(10000.0) / (half - 1)
    return jnp.exp(jnp.arange(half, dtype=jnp.float32) * jnp.float32(-emb))


def _sinusoidal_kernel(t_ref, freq_ref, out_ref, *, tile_b, half):
    # t_ref:    [b_padded, 1]  f32, VMEM-resident across all grid steps.
    # freq_ref: [1, half]      f32, VMEM-resident across all grid steps.
    # out_ref:  [tile_b, dim]  output tile for this grid step.
    start = pl.multiple_of(pl.program_id(0) * tile_b, 8)
    t = t_ref[pl.ds(start, tile_b), :]            # [tile_b, 1]
    arg = t * freq_ref[...]                       # [tile_b, half] f32
    # Exact sin / cos (no phase trick) -> bit-faithful to the PyTorch module.
    # When half % 128 == 0 both half-row stores are lane-dense.
    out_ref[:, :half] = jnp.sin(arg).astype(out_ref.dtype)
    out_ref[:, half:] = jnp.cos(arg).astype(out_ref.dtype)


def sinusoidal_position_embeddings(time, dim, *, tile_b=None,
                                   out_dtype=jnp.float32, force_pallas=False):
    """Equivalent of SinusoidalPositionEmbeddings(dim)(time). time: [B] -> [B, dim]."""
    assert dim % 2 == 0, "dim must be even to match the PyTorch module"
    assert dim >= 4, "dim must be >= 4 (half_dim - 1 would be zero for dim == 2)"

    time = jnp.asarray(time, dtype=jnp.float32)
    b = time.shape[0]
    half = dim // 2

    lane_dense = (half % 128 == 0)
    if not (lane_dense or force_pallas):
        # Sub-128 half-rows would lower to masked partial stores; for tiny dims
        # the fused XLA expression matches/beats a standalone kernel.
        emb = time[:, None] * _freqs(half)[None, :]
        return jnp.concatenate([jnp.sin(emb), jnp.cos(emb)], axis=-1).astype(out_dtype)

    freq_tab = _freqs(half).reshape(1, half)              # [1, half], resident

    itemsize = jnp.dtype(out_dtype).itemsize
    b8 = _round_up(b, 8)
    if tile_b is None:
        # ~4 MiB output blocks: amortizes ~0.35 us/step grid overhead; x2
        # buffers = ~8 MiB, inside every chip's scoped-VMEM default.
        target_rows = max(8, _round_down((4 << 20) // (dim * itemsize), 8))
        tile_b = min(b8, target_rows)
        # v7x megacore: keep >= 2 batch tiles when the batch is big enough so
        # both TensorCores get work (no-op on single-TC v5e/v6e).
        if b8 >= 16:
            tile_b = min(tile_b, _round_up(b8 // 2, 8))
    tile_b = max(8, _round_down(int(tile_b), 8))

    b_padded = _round_up(b, tile_b)
    t2d = time.reshape(b, 1)
    if b_padded != b:
        t2d = jnp.pad(t2d, ((0, b_padded - b), (0, 0)))

    # Explicit VMEM budget: double-buffered output blocks + resident time/freq,
    # capped at 32 MiB (safe under v7x's 64 MiB physical VMEM).
    vmem_need = 2 * tile_b * dim * itemsize + b_padded * 4 + half * 4
    vmem_limit = int(min(32 << 20, max(16 << 20, 3 * vmem_need)))

    kernel = functools.partial(_sinusoidal_kernel, tile_b=tile_b, half=half)
    out = pl.pallas_call(
        kernel,
        out_shape=jax.ShapeDtypeStruct((b_padded, dim), out_dtype),
        grid=(b_padded // tile_b,),
        in_specs=[
            # Whole timestep vector stays VMEM-resident (constant index_map);
            # the kernel slices its tile -> no per-step input DMA.
            pl.BlockSpec((b_padded, 1), lambda i: (0, 0)),
            pl.BlockSpec((1, half), lambda i: (0, 0)),     # resident freq table
        ],
        out_specs=pl.BlockSpec((tile_b, dim), lambda i: (i, 0)),
        compiler_params=pltpu.CompilerParams(
            dimension_semantics=("parallel",),             # megacore-shardable (v7x)
            vmem_limit_bytes=vmem_limit,
        ),
    )(t2d, freq_tab)

    return out[:b] if b_padded != b else out


def _reference(time, dim):
    # Pure-JAX reference matching the PyTorch forward exactly.
    time = jnp.asarray(time, dtype=jnp.float32)
    half = dim // 2
    emb = math.log(10000.0) / (half - 1)
    emb = jnp.exp(jnp.arange(half, dtype=jnp.float32) * -emb)
    emb = time[:, None] * emb[None, :]
    return jnp.concatenate([jnp.sin(emb), jnp.cos(emb)], axis=-1)


if __name__ == "__main__":
    key = jax.random.PRNGKey(0)
    k1, k2 = jax.random.split(key)

    # Config 1: lane-dense Pallas path (half % 128 == 0), multi-tile batch grid.
    dim1, batch1 = 256, 64
    time1 = jax.random.randint(k1, (batch1,), 0, 1000).astype(jnp.float32)
    out1 = jax.block_until_ready(sinusoidal_position_embeddings(time1, dim1))
    ref1 = _reference(time1, dim1)
    assert out1.shape == (batch1, dim1) and out1.dtype == jnp.float32
    assert jnp.allclose(out1, ref1, atol=1e-5, rtol=1e-5)

    # Config 2: the module's own example size (dim=10).  The wrapper dispatches
    # the non-lane-dense dim to the fused pure-JAX path; also force the Pallas
    # kernel to confirm it runs cleanly (masked stores) at this shape.
    dim2, batch2 = 10, 8
    time2 = jax.random.randint(k2, (batch2,), 0, 100).astype(jnp.float32)
    ref2 = _reference(time2, dim2)
    out2 = jax.block_until_ready(sinusoidal_position_embeddings(time2, dim2))
    assert out2.shape == (batch2, dim2)
    assert jnp.allclose(out2, ref2, atol=1e-6, rtol=1e-6)
    out2p = jax.block_until_ready(
        sinusoidal_position_embeddings(time2, dim2, force_pallas=True))
    assert jnp.allclose(out2p, ref2, atol=1e-5, rtol=1e-5)

    # Config 3: bf16 output path (halves the HBM write bytes — the kernel's floor).
    out3 = jax.block_until_ready(
        sinusoidal_position_embeddings(time1, dim1, out_dtype=jnp.bfloat16))
    assert out3.dtype == jnp.bfloat16
    assert jnp.allclose(out3.astype(jnp.float32), ref1, atol=2e-2, rtol=2e-2)

    print("KERNEL_OK")
</pallas_src>

<mosaic_0001>
module attributes {stable_mosaic.version = 11 : i64} {
  func.func @_sinusoidal_kernel(%arg0: i32, %arg1: memref<64x1xf32, #tpu.memory_space<vmem>>, %arg2: memref<1x128xf32, #tpu.memory_space<vmem>>, %arg3: memref<32x256xf32, #tpu.memory_space<vmem>>) attributes {dimension_semantics = [#tpu.dimension_semantics<parallel>], iteration_bounds = array<i64: 2>, scalar_prefetch = 0 : i64, scratch_operands = 0 : i64, tpu.core_type = #tpu.core_type<tc>, window_params = [{pipeline_mode = #tpu.pipeline_mode<synchronous>, transform_indices = @transform_0, window_bounds = array<i64: 64, 1>}, {pipeline_mode = #tpu.pipeline_mode<synchronous>, transform_indices = @transform_1, window_bounds = array<i64: 1, 128>}, {transform_indices = @transform_2, window_bounds = array<i64: 32, 256>}]} {
    %c32_i32 = arith.constant 32 : i32
    %0 = arith.muli %arg0, %c32_i32 : i32
    %1 = tpu.assume_multiple %0, 8 : i32
    %2 = arith.index_cast %1 : i32 to index
    %c0 = arith.constant 0 : index
    %3 = vector.load %arg1[%2, %c0] : memref<64x1xf32, #tpu.memory_space<vmem>>, vector<32x1xf32>
    %c0_0 = arith.constant 0 : index
    %c0_1 = arith.constant 0 : index
    %4 = vector.load %arg2[%c0_0, %c0_1] : memref<1x128xf32, #tpu.memory_space<vmem>>, vector<1x128xf32>
    %5 = vector.broadcast %3 : vector<32x1xf32> to vector<32x128xf32>
    %6 = vector.broadcast %4 : vector<1x128xf32> to vector<32x128xf32>
    %7 = arith.mulf %5, %6 : vector<32x128xf32>
    %8 = math.sin %7 : vector<32x128xf32>
    %c0_2 = arith.constant 0 : index
    %c0_3 = arith.constant 0 : index
    %9 = vector.load %arg3[%c0_2, %c0_3] : memref<32x256xf32, #tpu.memory_space<vmem>>, vector<32x128xf32>
    tpu.vector_store %arg3[%c0_2, %c0_3], %8 {strides = array<i32>} : memref<32x256xf32, #tpu.memory_space<vmem>>, vector<32x128xf32>,
    %10 = math.cos %7 : vector<32x128xf32>
    %c0_4 = arith.constant 0 : index
    %c128 = arith.constant 128 : index
    %11 = vector.load %arg3[%c0_4, %c128] : memref<32x256xf32, #tpu.memory_space<vmem>>, vector<32x128xf32>
    tpu.vector_store %arg3[%c0_4, %c128], %10 {strides = array<i32>} : memref<32x256xf32, #tpu.memory_space<vmem>>, vector<32x128xf32>,
    return
  }
  func.func @transform_0(%arg0: i32) -> (i32, i32) {
    %c0_i32 = arith.constant 0 : i32
    %c0_i32_0 = arith.constant 0 : i32
    %c0_i32_1 = arith.constant 0 : i32
    return %c0_i32, %c0_i32_0 : i32, i32
  }
  func.func @transform_1(%arg0: i32) -> (i32, i32) {
    %c0_i32 = arith.constant 0 : i32
    %c0_i32_0 = arith.constant 0 : i32
    %c0_i32_1 = arith.constant 0 : i32
    return %c0_i32, %c0_i32_0 : i32, i32
  }
  func.func @transform_2(%arg0: i32) -> (i32, i32) {
    %c0_i32 = arith.constant 0 : i32
    %c0_i32_0 = arith.constant 0 : i32
    return %arg0, %c0_i32 : i32, i32
  }
}

</mosaic_0001>

<bundles_post_ra>
// kernel: tpu_custom_call.1
= control target key start
LH: loop header
LB: loop body
LE: loop exit
PB: predicated region body
PF: predicated region fallthrough
CT: control target
= control target key end

     0   :  { %7 = vsyncpa [#allocation3], 0  ;;  %s1721_s0 = inlined_call_operand.vmem [shape: f32[64,1], index: 0, kind: input, shape index: {}]   ;;  %s1722_s1 = inlined_call_operand.vmem [shape: f32[1,128], index: 1, kind: input, shape index: {}]   ;;  %s1723_s2 = inlined_call_operand.hbm [shape: f32[64,256], index: 2, kind: output, shape index: {}]  }
   0x1   :  { %9 = vsyncpa [#allocation3 + $0x1], 0  ;;  %s1278_s9 = smov 0   ;;  %s1280_s10 = smov 0  }
   0x2   :  { %s1282_s11 = smov 0   ;;  %s1284_s12 = smov 0  }
   0x3 LB: > { %s1299_s13 = sadd.s32 4294967295, %s1251_s12   ;;  %s1063_s14 = sadd.s32 4294967294, %s1251_s12   ;;  %s1251_s12 = sphi %s1284_s12, %s1733_s12   ;;  %s1247_s11 = sphi %s1282_s11, %s1732_s11   ;;  %s1243_s10 = sphi %s1280_s10, %s1731_s10   ;;  %s1239_s9 = sphi %s1278_s9, %s1730_s9  }
   0x4   : > { %s1303_s15 = sadd.s32 1, %s1251_s12   ;;  %s64_s16 = sadd.s32 1, %s1247_s11 }
   0x5   : > { %s61_s17 = ssub.s32 %s1251_s12, %s1303_s15  ;;  %p74_p0 = scmp.ne.s32.totalorder %s1247_s11, %s1243_s10 }
   0x6   : > { %p62_p1 = scmp.eq.s32.totalorder %s61_s17, 0  ;;  %p75_p2 = scmp.eq.s32.totalorder %s1299_s13, 1 }
   0x7   : > { %p80_p3 = scmp.ne.s32.totalorder %s1243_s10, %s1239_s9  ;;  %p81_p4 = scmp.eq.s32.totalorder %s1063_s14, 1 }
   0x8   : > { %s1314_s18 = scalar_select %p62_p1, %s1247_s11, %s64_s16  }
   0x9   : > { %p1316_p5 = por %p75_p2, %p74_p0  ;;  %p1320_p6 = por %p81_p4, %p80_p3 }
   0xa   : > { %p1065_p7 = scmp.ge.s32.totalorder %s1251_s12, 1  ;;  %p105_p8 = scmp.lt.s32.totalorder %s1251_s12, 3 }
   0xc   : > { %p106_p9 = pnand %p1065_p7, %p105_p8 }
   0xd   : > { %s1067_s21 = sshll.u32 (!%p106_p9), %s1299_s13, 5  ;;  %s119_s27 = sand.u32 (!%p106_p9), 1, %s1243_s10  }
   0xe   : > { %109 = sbr.rel (%p106_p9) target bundleno = 303 (0x12f), region = 28  ;;  %s124_s24 = scalar_lea.vmem (!%p106_p9), %s1721_s0, %s1067_s21 }
   0xf   : > { %s1066_s28 = sshll.u32 (!%p106_p9), %s119_s27, 6  ;;  %s1108_s30 = sshll.u32 (!%p106_p9), %s1299_s13, 10 }
  0x10   : > { %s1625_s29 = scalar_lea.vmem (!%p106_p9), [#allocation2], %s1066_s28  ;;  %s1672_s6 = scalar_lea.hbm (!%p106_p9), %s1723_s2, %s1108_s30 }
  0x11   : > { %s1011_s3 = sshll.u32 (!%p106_p9), %s1625_s29, 4  ;;  %s1681_s7 = scalar_lea.sflag (!%p106_p9), [#allocation3], %s119_s27  ;;  %s1674_s3 = int_to_ptr.vmem [resolvable:$true] %s1011_s3 }
  0x12   : > { %s1191_s8 = scalar_lea.vmem (!%p106_p9), %s1674_s3, 1024  ;;  %s1260_s13 = smov (!%p106_p9), [#allocation2]  }
  0x13   : > { %v1253_v0 = vmov 0   ;;  %v127_v1 = vld [vmem:[%s124_s24 + $0x10] sm:$0xff]  ;;  %v125_v2 = vld [vmem:[%s124_s24] sm:$0xff]  ;;  %v128_v3 = vld [vmem:[%s124_s24 + $0x18] sm:$0xff]  ;;  %v1254_v38 = vmov 683565275   ;;  %p1192_p10 = scmp.ne.s32.totalorder %s1674_s3, %s1191_s8 }
  0x14   : > { %1174 = vset.pattern.permute.xlu1 %v1253_v0  ;;  %1173 = vset.pattern.permute.xlu0 %v1253_v0  ;;  %v126_v4 = vld [vmem:[%s124_s24 + $0x8] sm:$0xff]  ;;  %v1333_v5 = vld [vmem:[%s1722_s1] ss:$0 sm:$0xff]  ;;  %v1255_v42 = vmov 2475754826   ;;  %s1195_s14 = sshll.u32 %s1260_s13, 4  ;;  %s1196_s14 = int_to_ptr.vmem [resolvable:$false] %s1195_s14 }
  0x15   : > { %142 = vperm.xlu1 %1174, %v127_v1   ;;  %132 = vperm.xlu0 %1173, %v125_v2   ;;  %v1256_v44 = vmov 2131351028   ;;  %v1257_v46 = vmov 2102212464   ;;  %v1258_v48 = vmov 920167782   ;;  %p1193_p11 = pnand %p1192_p10, %p1316_p5  ;;  %p1198_p13 = scmp.lt.s32.totalorder %s1674_s3, %s1196_s14 }
  0x16   : > { %v1259_v55 = vmov 1326507024   ;;  %s1197_s16 = scalar_lea.vmem %s1196_s14, 2048 }
  0x17   : > { %p1194_p12 = pneg %p1193_p11  ;;  %p1199_p0 = scmp.lt.s32.totalorder %s1197_s16, %s1191_s8 }
  0x19   : > { %147 = vperm.xlu1 %1174, %v128_v3   ;;  %137 = vperm.xlu0 %1173, %v126_v4   ;;  %p1200_p1 = por %p1199_p0, %p1198_p13 }
  0x1b   : > { %p1201_p2 = pnand %p1200_p1, %p1194_p12 }
  0x90   : > { %v143_v6 = vpop.permute.xlu1 %142  ;;  %v133_v7 = vpop.permute.xlu0 %132 }
  0x91   : > { %v1336_v8 = vmul.f32 %v1333_v5, %v143_v6  ;;  %v1339_v9 = vmul.f32 %v1333_v5, %v133_v7 }
  0x93   : > { %v368_v10 = vand.u32 2147483647, %v1336_v8  ;;  %v371_v11 = vand.u32 2139095040, %v1336_v8  ;;  %v160_v12 = vand.u32 2147483647, %v1339_v9  ;;  %v163_v13 = vand.u32 2139095040, %v1339_v9 }
  0x94   : > { %v148_v14 = vpop.permute.xlu1 %147  ;;  %vm370_vm14 = vcmp.lt.s32.totalorder %v1336_v8, 0 }
  0x95   : > { %v372_v15 = vshrl.u32 %v371_v11, 23  ;;  %v1346_v16 = vmul.f32 %v1333_v5, %v148_v14  ;;  %v375_v17 = vand.u32 8388607, %v368_v10  ;;  %v164_v18 = vshrl.u32 %v163_v13, 23 }
  0x96   : > { %v167_v19 = vand.u32 8388607, %v160_v12  ;;  %vm1436_vm13 = vcmp.le.f32.partialorder %v368_v10, 0.7853982 }
  0x97   : > { %v1077_v20 = vadd.s32 4294967169, %v372_v15  ;;  %v1069_v21 = vadd.s32 4294967169, %v164_v18  ;;  %v475_v22 = vand.u32 2139095040, %v1346_v16  ;;  %v376_v24 = vor.u32 8388608, %v375_v17 }
  0x98   : > { %v168_v25 = vor.u32 8388608, %v167_v19  ;;  %v472_v36 = vand.u32 2147483647, %v1346_v16 }
  0x99   : > { %v378_v23 = vadd.s32 1, %v1077_v20  ;;  %v170_v26 = vadd.s32 1, %v1069_v21  ;;  %v476_v27 = vshrl.u32 %v475_v22, 23  ;;  %v1353_v33 = vshll.u32 %v376_v24, 8 }
  0x9a   : > { %v1357_v35 = vshll.u32 %v168_v25, 8 }
  0x9b   : > { %vm379_vm0 = vcmp.gt.s32.totalorder %v378_v23, 0  ;;  %vm171_vm1 = vcmp.gt.s32.totalorder %v170_v26, 0  ;;  %v1081_v29 = vadd.s32 4294967169, %v476_v27 }
  0x9c   : > { %v380_v28 = vsel %vm379_vm0, %v378_v23, 0  ;;  %v172_v32 = vsel %vm171_vm1, %v170_v26, 0 }
  0x9d   : > { %v381_v30 = vshrl.u32 %v380_v28, 5  ;;  %v382_v31 = vand.u32 31, %v380_v28  ;;  %v1355_v34 = vshrl.u32 %v172_v32, 5  ;;  %v174_v40 = vand.u32 31, %v172_v32 }
  0x9e   : > { %v1361_v41 = vadd.s32 1, %v1081_v29 }
  0x9f   : > { %v383_v37 = vsub.s32 32, %v382_v31  ;;  %v385_v39 = vshll.u32 %v1254_v38, %v382_v31  ;;  %v388_v43 = vshll.u32 %v1255_v42, %v382_v31  ;;  %v391_v45 = vshll.u32 %v1256_v44, %v382_v31 }
  0xa0   : > { %v394_v47 = vshll.u32 %v1257_v46, %v382_v31  ;;  %v397_v49 = vshll.u32 %v1258_v48, %v382_v31  ;;  %vm400_vm2 = vcmp.lt.s32.totalorder %v381_v30, 1  ;;  %vm401_vm3 = vcmp.lt.s32.totalorder %v381_v30, 2 }
  0xa1   : > { %v386_v50 = vshrl.u32 %v1255_v42, %v383_v37  ;;  %v389_v51 = vshrl.u32 %v1256_v44, %v383_v37  ;;  %v392_v52 = vshrl.u32 %v1257_v46, %v383_v37  ;;  %v384_v53 = vshrl.u32 %v1254_v38, %v383_v37 }
  0xa2   : > { %v395_v54 = vshrl.u32 %v1258_v48, %v383_v37  ;;  %v398_v56 = vshrl.u32 %v1259_v55, %v383_v37  ;;  %v175_v60 = vsub.s32 32, %v174_v40  ;;  %vm402_vm4 = vcmp.lt.s32.totalorder %v381_v30, 3 }
  0xa3   : > { %v387_v57 = vor.u32 %v386_v50, %v385_v39  ;;  %v390_v58 = vor.u32 %v389_v51, %v388_v43  ;;  %v393_v59 = vor.u32 %v392_v52, %v391_v45  ;;  %vm403_vm5 = vcmp.lt.s32.totalorder %v381_v30, 4 }
  0xa4   : > { %v396_v61 = vor.u32 %v395_v54, %v394_v47  ;;  %v399_v62 = vor.u32 %v398_v56, %v397_v49  ;;  %v177_v7 = vshll.u32 %v1254_v38, %v174_v40  ;;  %v178_v14 = vshrl.u32 %v1255_v42, %v175_v60 }
  0xa5   : > { %v404_v63 = vsel %vm400_vm2, %v384_v53, %v387_v57  ;;  %v405_v0 = vsel %vm403_vm5, %v393_v59, 2102212464  ;;  %v408_v1 = vsel %vm400_vm2, %v387_v57, %v390_v58  ;;  %v412_v2 = vsel %vm400_vm2, %v390_v58, %v393_v59 }
  0xa6   : > { %v406_v3 = vsel %vm402_vm4, %v390_v58, %v405_v0  ;;  %v409_v4 = vsel %vm403_vm5, %v396_v61, 920167782  ;;  %v413_v6 = vsel %vm403_vm5, %v399_v62, 1326507024  ;;  %v180_v15 = vshll.u32 %v1255_v42, %v174_v40  ;;  %v138_v58 = vpop.permute.xlu0 %137 }
  0xa7   : > { %v410_v11 = vsel %vm402_vm4, %v393_v59, %v409_v4  ;;  %v414_v13 = vsel %vm402_vm4, %v396_v61, %v413_v6  ;;  %v407_v17 = vsel %vm401_vm3, %v404_v63, %v406_v3  ;;  %v181_v20 = vshrl.u32 %v1256_v44, %v175_v60 }
  0xa8   : > { %v411_v18 = vsel %vm401_vm3, %v408_v1, %v410_v11  ;;  %v415_v19 = vsel %vm401_vm3, %v412_v2, %v414_v13  ;;  %v179_v25 = vor.u32 %v178_v14, %v177_v7  ;;  %v183_v27 = vshll.u32 %v1256_v44, %v174_v40 }
  0xa9   : > { %v1384_v21 = vmul.u32.u64.low %v1353_v33, %v415_v19  ;;  %v1385_v22 = vmul.u32.u64.high %v1353_v33, %v415_v19, %v1384_v21  ;;  %v1388_v23 = vmul.u32.u64.low %v1353_v33, %v411_v18  ;;  %v1389_v24 = vmul.u32.u64.high %v1353_v33, %v411_v18, %v1388_v23 }
  0xaa   : > { %v182_v26 = vor.u32 %v181_v20, %v180_v15  ;;  %v184_v28 = vshrl.u32 %v1257_v46, %v175_v60  ;;  %v176_v29 = vshrl.u32 %v1254_v38, %v175_v60  ;;  %v186_v30 = vshll.u32 %v1257_v46, %v174_v40 }
  0xab   : > { %v187_v31 = vshrl.u32 %v1258_v48, %v175_v60  ;;  %v190_v32 = vshrl.u32 %v1259_v55, %v175_v60  ;;  %v423_v37 = vmul.u32 %v1353_v33, %v407_v17  ;;  %v189_v43 = vshll.u32 %v1258_v48, %v174_v40 }
  0xac   : > { %v185_v39 = vor.u32 %v184_v28, %v183_v27  ;;  %vm192_vm6 = vcmp.lt.s32.totalorder %v1355_v34, 1  ;;  %vm425_vm7 = vc.u32 %v1385_v22, %v1388_v23  ;;  %v426_v45 = vadd.s32 1, %v1389_v24 }
  0xad   : > { %v188_v47 = vor.u32 %v187_v31, %v186_v30  ;;  %vm193_vm8 = vcmp.lt.s32.totalorder %v1355_v34, 2  ;;  %v191_v49 = vor.u32 %v190_v32, %v189_v43  ;;  %vm194_vm9 = vcmp.lt.s32.totalorder %v1355_v34, 3 }
  0xae   : > { %vm195_vm10 = vcmp.lt.s32.totalorder %v1355_v34, 4  ;;  %v200_v50 = vsel %vm192_vm6, %v179_v25, %v182_v26  ;;  %v427_v33 = vsel %vm425_vm7, %v426_v45, %v1389_v24  ;;  %v204_v52 = vsel %vm192_vm6, %v182_v26, %v185_v39 }
  0xaf   : > { %v197_v51 = vsel %vm195_vm10, %v185_v39, 2102212464  ;;  %v201_v40 = vsel %vm195_vm10, %v188_v47, 920167782  ;;  %v428_v53 = vadd.s32 %v427_v33, %v423_v37  ;;  %v196_v54 = vsel %vm192_vm6, %v176_v29, %v179_v25 }
  0xb0   : > { %v202_v56 = vsel %vm194_vm9, %v185_v39, %v201_v40  ;;  %v205_v57 = vsel %vm195_vm10, %v191_v49, 1326507024  ;;  %v198_v59 = vsel %vm194_vm9, %v182_v26, %v197_v51  ;;  %vm483_vm11 = vcmp.gt.s32.totalorder %v1361_v41, 0 }
  0xb1   : > { %v203_v60 = vsel %vm193_vm8, %v200_v50, %v202_v56  ;;  %v206_v61 = vsel %vm194_vm9, %v188_v47, %v205_v57  ;;  %v429_v62 = vadd.s32 536870912, %v428_v53  ;;  %v1422_v4 = vmul.f32 %v1333_v5, %v138_v58 }
  0xb2   : > { %v207_v63 = vsel %vm193_vm8, %v204_v52, %v206_v61  ;;  %v1414_v0 = vmul.u32.u64.low %v1357_v35, %v203_v60  ;;  %v1415_v1 = vmul.u32.u64.high %v1357_v35, %v203_v60, %v1414_v0  ;;  %v199_v7 = vsel %vm193_vm8, %v196_v54, %v198_v59 }
  0xb3   : > { %v1418_v2 = vmul.u32.u64.low %v1357_v35, %v207_v63  ;;  %v1419_v3 = vmul.u32.u64.high %v1357_v35, %v207_v63, %v1418_v2  ;;  %v430_v6 = vshrl.u32 %v429_v62, 30  ;;  %v484_v11 = vsel %vm483_vm11, %v1361_v41, 0 }
  0xb4   : > { %v218_v14 = vadd.s32 1, %v1415_v1  ;;  %v479_v15 = vand.u32 8388607, %v472_v36  ;;  %v215_v17 = vmul.u32 %v1357_v35, %v199_v7  ;;  %v267_v18 = vand.u32 2139095040, %v1422_v4 }
  0xb5   : > { %v431_v13 = vshll.u32 %v430_v6, 30  ;;  %vm217_vm12 = vc.u32 %v1419_v3, %v1414_v0  ;;  %v486_v20 = vand.u32 31, %v484_v11  ;;  %v454_v41 = vsub.s32 4, %v430_v6 }
  0xb6   : > { %v219_v19 = vsel %vm217_vm12, %v218_v14, %v1415_v1  ;;  %v480_v24 = vor.u32 8388608, %v479_v15  ;;  %v268_v26 = vshrl.u32 %v267_v18, 23  ;;  %v264_v30 = vand.u32 2147483647, %v1422_v4 }
  0xb7   : > { %v432_v5 = vsub.s32 %v428_v53, %v431_v13  ;;  %v220_v34 = vadd.s32 %v219_v19, %v215_v17  ;;  %v487_v28 = vsub.s32 32, %v486_v20  ;;  %v424_v31 = vadd.s32 %v1388_v23, %v1385_v22 }
  0xb8   : > { %v1446_v37 = vshrl.u32 %v484_v11, 5  ;;  %v1448_v39 = vshll.u32 %v480_v24, 8  ;;  %v455_v10 = vsel %vm370_vm14, %v454_v41, %v430_v6  ;;  %v1453_v43 = vadd.s32 %v1414_v0, %v1419_v3 }
  0xb9   : > { %v434_v21 = vsub.s32 0, %v432_v5  ;;  %v221_v25 = vadd.s32 536870912, %v220_v34  ;;  %v1073_v47 = vadd.s32 4294967169, %v268_v26  ;;  %v489_v50 = vshll.u32 %v1254_v38, %v486_v20 }
  0xba   : > { %v490_v33 = vshrl.u32 %v1255_v42, %v487_v28  ;;  %v492_v22 = vshll.u32 %v1255_v42, %v486_v20  ;;  %v493_v51 = vshrl.u32 %v1256_v44, %v487_v28  ;;  %v496_v40 = vshrl.u32 %v1257_v46, %v487_v28 }
  0xbb   : > { %v1078_v27 = vmin.u32 %v434_v21, %v432_v5  ;;  %v1441_v29 = vshrl.u32 %v221_v25, 30  ;;  %v499_v52 = vshrl.u32 %v1258_v48, %v487_v28  ;;  %v1466_v53 = vsel %vm1436_vm13, 0, %v455_v10 }
  0xbc   : > { %v488_v54 = vshrl.u32 %v1254_v38, %v487_v28  ;;  %v502_v56 = vshrl.u32 %v1259_v55, %v487_v28  ;;  %v495_v59 = vshll.u32 %v1256_v44, %v486_v20  ;;  %v498_v60 = vshll.u32 %v1257_v46, %v486_v20 }
  0xbd   : > { %v436_v32 = vclz %v1078_v27  ;;  %v223_v45 = vshll.u32 %v1441_v29, 30  ;;  %v491_v63 = vor.u32 %v490_v33, %v489_v50  ;;  %v501_v0 = vshll.u32 %v1258_v48, %v486_v20 }
  0xbe   : > { %v494_v2 = vor.u32 %v493_v51, %v492_v22  ;;  %v497_v3 = vor.u32 %v496_v40, %v495_v59  ;;  %v500_v6 = vor.u32 %v499_v52, %v498_v60  ;;  %v246_v17 = vsub.s32 4, %v1441_v29 }
  0xbf   : > { %v1079_v49 = vadd.s32 4294967294, %v436_v32  ;;  %v1459_v23 = vsub.s32 %v220_v34, %v223_v45  ;;  %v503_v14 = vor.u32 %v502_v56, %v501_v0  ;;  %vm504_vm0 = vcmp.lt.s32.totalorder %v1446_v37, 1 }
  0xc0   : > { %vm505_vm1 = vcmp.lt.s32.totalorder %v1446_v37, 2  ;;  %vm506_vm2 = vcmp.lt.s32.totalorder %v1446_v37, 3  ;;  %vm507_vm3 = vcmp.lt.s32.totalorder %v1446_v37, 4  ;;  %v516_v21 = vsel %vm504_vm0, %v494_v2, %v497_v3 }
  0xc1   : > { %vm1080_vm15 = vcmp.lt.s32.totalorder %v1079_v49, 0  ;;  %v226_v58 = vsub.s32 0, %v1459_v23  ;;  %v513_v34 = vsel %vm507_vm3, %v500_v6, 920167782  ;;  %vm162_vm4 = vcmp.lt.s32.totalorder %v1339_v9, 0 }
  0xc2   : > { %v439_v57 = vsel %vm1080_vm15, 0, %v1079_v49  ;;  %v509_v41 = vsel %vm507_vm3, %v497_v3, 2102212464  ;;  %v514_v25 = vsel %vm506_vm2, %v497_v3, %v513_v34  ;;  %v517_v26 = vsel %vm507_vm3, %v503_v14, 1326507024 }
  0xc3   : > { %v440_v61 = vsub.s32 32, %v439_v57  ;;  %v444_v62 = vsub.s32 4294967266, %v439_v57  ;;  %v1070_v1 = vmin.u32 %v226_v58, %v1459_v23  ;;  %v441_v7 = vshll.u32 %v432_v5, %v439_v57 }
  0xc4   : > { %v512_v5 = vsel %vm504_vm0, %v491_v63, %v494_v2  ;;  %v508_v28 = vsel %vm504_vm0, %v488_v54, %v491_v63  ;;  %v510_v22 = vsel %vm506_vm2, %v494_v2, %v509_v41  ;;  %v274_v51 = vadd.s32 1, %v1073_v47 }
  0xc5   : > { %v442_v11 = vshrl.u32 %v424_v31, %v440_v61  ;;  %v445_v13 = vadd.s32 127, %v444_v62  ;;  %v228_v15 = vclz %v1070_v1  ;;  %v518_v31 = vsel %vm506_vm2, %v500_v6, %v517_v26 }
  0xc6   : > { %v515_v45 = vsel %vm505_vm1, %v512_v5, %v514_v25  ;;  %v519_v49 = vsel %vm505_vm1, %v516_v21, %v518_v31  ;;  %v461_v62 = vadd.s32 3, %v1466_v53  ;;  %vm1511_vm6 = vcmp.le.f32.partialorder %v160_v12, 0.7853982 }
  0xc7   : > { %v443_v18 = vor.u32 %v442_v11, %v441_v7  ;;  %v446_v19 = vshll.u32 %v445_v13, 23  ;;  %v1071_v20 = vadd.s32 4294967294, %v228_v15  ;;  %vm275_vm7 = vcmp.gt.s32.totalorder %v274_v51, 0 }
  0xc8   : > { %v1499_v54 = vmul.u32.u64.low %v1448_v39, %v519_v49  ;;  %v1500_v56 = vmul.u32.u64.high %v1448_v39, %v519_v49, %v1499_v54  ;;  %v1504_v59 = vmul.u32.u64.low %v1448_v39, %v515_v45  ;;  %v1505_v60 = vmul.u32.u64.high %v1448_v39, %v515_v45, %v1504_v59 }
  0xc9   : > { %v447_v24 = vor.u32 4788187, %v446_v19  ;;  %v450_v27 = vcvt.s32.f32 %v443_v18  ;;  %vm1072_vm5 = vcmp.lt.s32.totalorder %v1071_v20, 0  ;;  %v276_v0 = vsel %vm275_vm7, %v274_v51, 0 }
  0xca   : > { %v231_v10 = vsel %vm1072_vm5, 0, %v1071_v20  ;;  %v1520_v2 = vand.u32 3, %v1466_v53  ;;  %vm529_vm8 = vc.u32 %v1500_v56, %v1504_v59  ;;  %v271_v12 = vand.u32 8388607, %v264_v30 }
  0xcb   : > { %v448_v32 = vand.u32 2147483647, %v447_v24  ;;  %v232_v50 = vsub.s32 32, %v231_v10  ;;  %v236_v33 = vsub.s32 4294967266, %v231_v10  ;;  %v233_v52 = vshll.u32 %v1459_v23, %v231_v10 }
  0xcc   : > { %v247_v37 = vsel %vm162_vm4, %v246_v17, %v1441_v29  ;;  %v530_v7 = vadd.s32 1, %v1505_v60  ;;  %v1533_v53 = vand.u32 3, %v461_v62  ;;  %v278_v13 = vand.u32 31, %v276_v0 }
  0xcd   : > { %v451_v40 = vmul.f32 %v450_v27, %v448_v32  ;;  %v234_v57 = vshrl.u32 %v1453_v43, %v232_v50  ;;  %v237_v58 = vadd.s32 127, %v236_v33  ;;  %v511_v43 = vsel %vm505_vm1, %v508_v28, %v510_v22 }
  0xce   : > { %v527_v11 = vmul.u32 %v1448_v39, %v511_v43  ;;  %v531_v18 = vsel %vm529_vm8, %v530_v7, %v1505_v60  ;;  %v249_v35 = vsel %vm1511_vm6, 0, %v247_v37  ;;  %v1539_v20 = vshrl.u32 %v276_v0, 5 }
  0xcf   : > { %v452_v61 = vxor.u32 2147483648, %v451_v40  ;;  %v235_v23 = vor.u32 %v234_v57, %v233_v52  ;;  %v238_v63 = vshll.u32 %v237_v58, 23  ;;  %v279_v29 = vsub.s32 32, %v278_v13 }
  0xd0   : > { %v532_v19 = vadd.s32 %v531_v18, %v527_v11  ;;  %v281_v5 = vshll.u32 %v1254_v38, %v278_v13  ;;  %v284_v34 = vshll.u32 %v1255_v42, %v278_v13  ;;  %v287_v39 = vshll.u32 %v1256_v44, %v278_v13 }
  0xd1   : > { %v453_v1 = vsel %vm370_vm14, %v452_v61, %v451_v40  ;;  %v239_v6 = vor.u32 4788187, %v238_v63  ;;  %v242_v15 = vcvt.s32.f32 %v235_v23  ;;  %v282_v24 = vshrl.u32 %v1255_v42, %v279_v29 }
  0xd2   : > { %v456_v3 = vsel %vm1436_vm13, %v1336_v8, %v453_v1  ;;  %v533_v21 = vadd.s32 536870912, %v532_v19  ;;  %v285_v41 = vshrl.u32 %v1256_v44, %v279_v29  ;;  %v290_v25 = vshll.u32 %v1257_v46, %v278_v13 }
  0xd3   : > { %1175 = vcosq.f32 %v456_v3  ;;  %v240_v14 = vand.u32 2147483647, %v239_v6  ;;  %v288_v27 = vshrl.u32 %v1257_v46, %v279_v29  ;;  %v291_v28 = vshrl.u32 %v1258_v48, %v279_v29 }
  0xd4   : > { %1177 = vsinq.f32 %v456_v3  ;;  %v294_v31 = vshrl.u32 %v1259_v55, %v279_v29  ;;  %v1550_v32 = vshrl.u32 %v533_v21, 30  ;;  %v272_v10 = vor.u32 8388608, %v271_v12 }
  0xd5   : > { %v243_v17 = vmul.f32 %v242_v15, %v240_v14  ;;  %v283_v45 = vor.u32 %v282_v24, %v281_v5  ;;  %v286_v49 = vor.u32 %v285_v41, %v284_v34  ;;  %v289_v42 = vor.u32 %v288_v27, %v287_v39 }
  0xd6   : > { %v292_v33 = vor.u32 %v291_v28, %v290_v25  ;;  %v293_v44 = vshll.u32 %v1258_v48, %v278_v13  ;;  %vm881_vm9 = vcmp.eq.s32.totalorder %v1520_v2, 0  ;;  %v535_v55 = vshll.u32 %v1550_v32, 30 }
  0xd7   : > { %v244_v26 = vxor.u32 2147483648, %v243_v17  ;;  %vm296_vm10 = vcmp.lt.s32.totalorder %v1539_v20, 1  ;;  %vm299_vm11 = vcmp.lt.s32.totalorder %v1539_v20, 4  ;;  %vm880_vm12 = vcmp.lt.s32.totalorder %v1520_v2, 2 }
  0xd8   : > { %v295_v22 = vor.u32 %v294_v31, %v293_v44  ;;  %v304_v48 = vsel %vm296_vm10, %v283_v45, %v286_v49  ;;  %v305_v51 = vsel %vm299_vm11, %v292_v33, 920167782  ;;  %vm460_vm13 = vweird.f32 %v1336_v8 }
  0xd9   : > { %v245_v50 = vsel %vm162_vm4, %v244_v26, %v243_v17  ;;  %vm884_vm14 = vcmp.eq.s32.totalorder %v1520_v2, 2  ;;  %v1569_v40 = vsub.s32 %v532_v19, %v535_v55  ;;  %vm298_vm15 = vcmp.lt.s32.totalorder %v1539_v20, 3 }
  0xda   : > { %v248_v46 = vsel %vm1511_vm6, %v1339_v9, %v245_v50  ;;  %vm463_vm0 = vcmp.lt.s32.totalorder %v1533_v53, 2  ;;  %vm297_vm1 = vcmp.lt.s32.totalorder %v1539_v20, 2  ;;  %v306_v52 = vsel %vm298_vm15, %v289_v42, %v305_v51 }
  0xdb   : > { %1179 = vcosq.f32 %v248_v46  ;;  %v1577_v54 = vshll.u32 %v272_v10, 8  ;;  %vm464_vm2 = vcmp.eq.s32.totalorder %v1533_v53, 0  ;;  %v253_v57 = vadd.s32 3, %v249_v35 }
  0xdc   : > { %1181 = vsinq.f32 %v248_v46  ;;  %v538_v58 = vsub.s32 0, %v1569_v40  ;;  %v307_v60 = vsel %vm297_vm1, %v304_v48, %v306_v52  ;;  %vm467_vm3 = vcmp.eq.s32.totalorder %v1533_v53, 2 }
  0xdd   : > { %v309_v62 = vsel %vm299_vm11, %v295_v22, 1326507024  ;;  %v1587_v47 = vmul.u32.u64.low %v1577_v54, %v307_v60  ;;  %v1588_v23 = vmul.u32.u64.high %v1577_v54, %v307_v60, %v1587_v47  ;;  %v673_v0 = vand.u32 3, %v249_v35 }
  0xde   : > { %v1082_v1 = vmin.u32 %v538_v58, %v1569_v40  ;;  %v301_v12 = vsel %vm299_vm11, %v289_v42, 2102212464  ;;  %v280_v6 = vshrl.u32 %v1254_v38, %v279_v29  ;;  %v308_v37 = vsel %vm296_vm10, %v286_v49, %v289_v42 }
  0xdf   : > { %v310_v7 = vsel %vm298_vm15, %v292_v33, %v309_v62  ;;  %v254_v14 = vand.u32 3, %v253_v57  ;;  %v302_v19 = vsel %vm298_vm15, %v286_v49, %v301_v12  ;;  %vm674_vm4 = vcmp.lt.s32.totalorder %v673_v0, 2 }
  0xe0   : > { %v1176_v61 = vpop.eup %1175  ;;  %v540_v15 = vclz %v1082_v1  ;;  %v300_v38 = vsel %vm296_vm10, %v280_v6, %v283_v45  ;;  %v311_v34 = vsel %vm297_vm1, %v308_v37, %v310_v7  ;;  %v322_v53 = vadd.s32 1, %v1588_v23 }
  0xe1   : > { %v1178_v63 = vpop.eup %1177  ;;  %v468_v43 = vxor.u32 2147483648, %v1176_v61  ;;  %v1622_v24 = vmul.u32.u64.low %v1577_v54, %v311_v34  ;;  %v1623_v41 = vmul.u32.u64.high %v1577_v54, %v311_v34, %v1622_v24  ;;  %v303_v2 = vsel %vm297_vm1, %v300_v38, %v302_v19 }
  0xe2   : > { %v465_v3 = vxor.u32 2147483648, %v1178_v63  ;;  %v1083_v5 = vadd.s32 4294967294, %v540_v15  ;;  %vm255_vm6 = vcmp.lt.s32.totalorder %v254_v14, 2  ;;  %vm675_vm7 = vcmp.eq.s32.totalorder %v673_v0, 0 }
  0xe3   : > { %v469_v11 = vsel %vm467_vm3, %v468_v43, %v1178_v63  ;;  %v886_v13 = vsel %vm884_vm14, %v468_v43, %v1178_v63  ;;  %vm678_vm8 = vcmp.eq.s32.totalorder %v673_v0, 2  ;;  %v528_v26 = vadd.s32 %v1504_v59, %v1500_v56 }
  0xe4   : > { %v466_v18 = vsel %vm464_vm2, %v1176_v61, %v465_v3  ;;  %v883_v35 = vsel %vm881_vm9, %v1176_v61, %v465_v3  ;;  %vm1084_vm5 = vcmp.lt.s32.totalorder %v1083_v5, 0  ;;  %vm259_vm9 = vcmp.eq.s32.totalorder %v254_v14, 2 }
  0xe5   : > { %v470_v29 = vsel %vm463_vm0, %v466_v18, %v469_v11  ;;  %v887_v17 = vsel %vm880_vm12, %v883_v35, %v886_v13  ;;  %v543_v8 = vsel %vm1084_vm5, 0, %v1083_v5  ;;  %v319_v20 = vmul.u32 %v1577_v54, %v303_v2 }
  0xe6   : > { %v471_v39 = vsel %vm460_vm13, nan, %v470_v29  ;;  %v888_v21 = vsel %vm460_vm13, nan, %v887_v17  ;;  %v544_v27 = vsub.s32 32, %v543_v8  ;;  %v548_v28 = vsub.s32 4294967266, %v543_v8 }
  0xe7   : > { %578 = vst [vmem:[%s1625_s29 + $0x20] sm:$0xff] %v471_v39  ;;  %994 = vst [vmem:[%s1625_s29 + $0x28] sm:$0xff] %v888_v21  ;;  %v545_v45 = vshll.u32 %v1569_v40, %v543_v8  ;;  %vm321_vm10 = vc.u32 %v1623_v41, %v1587_v47  ;;  %vm256_vm11 = vcmp.eq.s32.totalorder %v254_v14, 0  ;;  %vm252_vm12 = vweird.f32 %v1339_v9 }
  0xe8   : > { %v1180_v25 = vpop.eup %1179  ;;  %v546_v50 = vshrl.u32 %v528_v26, %v544_v27  ;;  %v549_v42 = vadd.s32 127, %v548_v28  ;;  %v323_v33 = vsel %vm321_vm10, %v322_v53, %v1588_v23  ;;  %vm474_vm13 = vcmp.lt.s32.totalorder %v1346_v16, 0 }
  0xe9   : > { %v1182_v31 = vpop.eup %1181  ;;  %v260_v10 = vxor.u32 2147483648, %v1180_v25  ;;  %v324_v44 = vadd.s32 %v323_v33, %v319_v20  ;;  %v558_v9 = vsub.s32 4, %v1550_v32  ;;  %vm473_vm14 = vcmp.le.f32.partialorder %v472_v36, 0.7853982 }
  0xea   : > { %v257_v49 = vxor.u32 2147483648, %v1182_v31  ;;  %v547_v22 = vor.u32 %v546_v50, %v545_v45  ;;  %v550_v48 = vshll.u32 %v549_v42, 23  ;;  %v320_v18 = vadd.s32 %v1587_v47, %v1623_v41 }
  0xeb   : > { %v261_v56 = vsel %vm259_vm9, %v260_v10, %v1182_v31  ;;  %v680_v59 = vsel %vm678_vm8, %v260_v10, %v1182_v31  ;;  %v325_v52 = vadd.s32 536870912, %v324_v44  ;;  %v559_v37 = vsel %vm474_vm13, %v558_v9, %v1550_v32 }
  0xec   : > { %v258_v46 = vsel %vm256_vm11, %v1180_v25, %v257_v49  ;;  %v677_v55 = vsel %vm675_vm7, %v1180_v25, %v257_v49  ;;  %v551_v58 = vor.u32 4788187, %v550_v48  ;;  %v554_v62 = vcvt.s32.f32 %v547_v22 }
  0xed   : > { %v262_v51 = vsel %vm255_vm6, %v258_v46, %v261_v56  ;;  %v681_v40 = vsel %vm674_vm4, %v677_v55, %v680_v59  ;;  %v1646_v60 = vshrl.u32 %v325_v52, 30  ;;  %v561_v13 = vsel %vm473_vm14, 0, %v559_v37 }
  0xee   : > { %v263_v54 = vsel %vm252_vm12, nan, %v262_v51  ;;  %v682_v57 = vsel %vm252_vm12, nan, %v681_v40  ;;  %v552_v61 = vand.u32 2147483647, %v551_v58  ;;  %v565_v15 = vadd.s32 3, %v561_v13 }
  0xef   : > { %576 = vst [vmem:[%s1625_s29] sm:$0xff] %v263_v54  ;;  %992 = vst [vmem:[%s1625_s29 + $0x8] sm:$0xff] %v682_v57  ;;  %v327_v23 = vshll.u32 %v1646_v60, 30  ;;  %v982_v17 = vand.u32 3, %v561_v13  ;;  %vm564_vm6 = vweird.f32 %v1346_v16  ;;  %vm266_vm7 = vcmp.lt.s32.totalorder %v1422_v4, 0 }
  0xf0   : > { %v555_v63 = vmul.f32 %v554_v62, %v552_v61  ;;  %v566_v5 = vand.u32 3, %v565_v15  ;;  %v350_v50 = vsub.s32 4, %v1646_v60  ;;  %vm265_vm8 = vcmp.le.f32.partialorder %v264_v30, 0.7853982 }
  0xf1   : > { %v328_v43 = vsub.s32 %v324_v44, %v327_v23  ;;  %vm983_vm0 = vcmp.lt.s32.totalorder %v982_v17, 2  ;;  %vm987_vm1 = vcmp.eq.s32.totalorder %v982_v17, 2  ;;  %vm984_vm4 = vcmp.eq.s32.totalorder %v982_v17, 0 }
  0xf2   : > { %v556_v1 = vxor.u32 2147483648, %v555_v63  ;;  %vm571_vm2 = vcmp.eq.s32.totalorder %v566_v5, 2  ;;  %vm568_vm3 = vcmp.eq.s32.totalorder %v566_v5, 0  ;;  %vm567_vm5 = vcmp.lt.s32.totalorder %v566_v5, 2 }
  0xf3   : > { %v330_v0 = vsub.s32 0, %v328_v43  ;;  %v351_v33 = vsel %vm266_vm7, %v350_v50, %v1646_v60 }
  0xf4   : > { %v557_v12 = vsel %vm474_vm13, %v556_v1, %v555_v63  ;;  %v353_v56 = vsel %vm265_vm8, 0, %v351_v33 }
  0xf5   : > { %v560_v3 = vsel %vm473_vm14, %v1346_v16, %v557_v12  ;;  %v1074_v6 = vmin.u32 %v330_v0, %v328_v43  ;;  %v357_v59 = vadd.s32 3, %v353_v56  ;;  %v776_v46 = vand.u32 3, %v353_v56 }
  0xf6   : > { %1183 = vcosq.f32 %v560_v3 }
  0xf7   : > { %1185 = vsinq.f32 %v560_v3  ;;  %v332_v7 = vclz %v1074_v6  ;;  %v358_v44 = vand.u32 3, %v357_v59  ;;  %vm781_vm10 = vcmp.eq.s32.totalorder %v776_v46, 2 }
  0xf8   : > { %vm778_vm12 = vcmp.eq.s32.totalorder %v776_v46, 0  ;;  %vm777_vm14 = vcmp.lt.s32.totalorder %v776_v46, 2 }
  0xf9   : > { %v1075_v11 = vadd.s32 4294967294, %v332_v7  ;;  %vm363_vm9 = vcmp.eq.s32.totalorder %v358_v44, 2  ;;  %vm360_vm11 = vcmp.eq.s32.totalorder %v358_v44, 0  ;;  %vm359_vm13 = vcmp.lt.s32.totalorder %v358_v44, 2 }
  0xfb   : > { %vm1076_vm15 = vcmp.lt.s32.totalorder %v1075_v11, 0 }
  0xfc   : > { %v335_v14 = vsel %vm1076_vm15, 0, %v1075_v11  ;;  %vm356_vm15 = vweird.f32 %v1422_v4 }
  0xfd   : > { %v336_v35 = vsub.s32 32, %v335_v14  ;;  %v340_v38 = vsub.s32 4294967266, %v335_v14  ;;  %v337_v36 = vshll.u32 %v328_v43, %v335_v14 }
  0xff   : > { %v338_v19 = vshrl.u32 %v320_v18, %v336_v35  ;;  %v341_v29 = vadd.s32 127, %v340_v38 }
 0x101   : > { %v339_v34 = vor.u32 %v338_v19, %v337_v36  ;;  %v342_v39 = vshll.u32 %v341_v29, 23 }
 0x103   : > { %v1184_v32 = vpop.eup %1183  ;;  %v343_v21 = vor.u32 4788187, %v342_v39  ;;  %v346_v47 = vcvt.s32.f32 %v339_v34 }
 0x104   : > { %v1186_v24 = vpop.eup %1185  ;;  %v572_v2 = vxor.u32 2147483648, %v1184_v32 }
 0x105   : > { %v569_v53 = vxor.u32 2147483648, %v1186_v24  ;;  %v344_v8 = vand.u32 2147483647, %v343_v21 }
 0x106   : > { %v573_v41 = vsel %vm571_vm2, %v572_v2, %v1186_v24  ;;  %v989_v25 = vsel %vm987_vm1, %v572_v2, %v1186_v24 }
 0x107   : > { %v570_v26 = vsel %vm568_vm3, %v1184_v32, %v569_v53  ;;  %v986_v27 = vsel %vm984_vm4, %v1184_v32, %v569_v53  ;;  %v347_v28 = vmul.f32 %v346_v47, %v344_v8 }
 0x108   : > { %v574_v31 = vsel %vm567_vm5, %v570_v26, %v573_v41  ;;  %v990_v10 = vsel %vm983_vm0, %v986_v27, %v989_v25 }
 0x109   : > { %v575_v45 = vsel %vm564_vm6, nan, %v574_v31  ;;  %v991_v20 = vsel %vm564_vm6, nan, %v990_v10  ;;  %v348_v49 = vxor.u32 2147483648, %v347_v28 }
 0x10a   : > { %579 = vst [vmem:[%s1625_s29 + $0x30] sm:$0xff] %v575_v45  ;;  %995 = vst [vmem:[%s1625_s29 + $0x38] sm:$0xff] %v991_v20 }
 0x10b   : > { %v349_v42 = vsel %vm266_vm7, %v348_v49, %v347_v28 }
 0x10c   : > { %v352_v16 = vsel %vm265_vm8, %v1422_v4, %v349_v42 }
 0x10d   : > { %1187 = vcosq.f32 %v352_v16 }
 0x10e   : > { %1189 = vsinq.f32 %v352_v16 }
 0x11a   : > { %v1188_v55 = vpop.eup %1187 }
 0x11b   : > { %v1190_v22 = vpop.eup %1189  ;;  %v364_v48 = vxor.u32 2147483648, %v1188_v55 }
 0x11c   : > { %v361_v51 = vxor.u32 2147483648, %v1190_v22 }
 0x11d   : > { %v365_v30 = vsel %vm363_vm9, %v364_v48, %v1190_v22  ;;  %v783_v40 = vsel %vm781_vm10, %v364_v48, %v1190_v22 }
 0x11e   : > { %v362_v52 = vsel %vm360_vm11, %v1188_v55, %v361_v51  ;;  %v780_v54 = vsel %vm778_vm12, %v1188_v55, %v361_v51 }
 0x11f   : > { %v366_v57 = vsel %vm359_vm13, %v362_v52, %v365_v30  ;;  %v784_v58 = vsel %vm777_vm14, %v780_v54, %v783_v40 }
 0x120   : > { %v367_v60 = vsel %vm356_vm15, nan, %v366_v57  ;;  %v785_v61 = vsel %vm356_vm15, nan, %v784_v58 }
 0x121   : > { %577 = vst [vmem:[%s1625_s29 + $0x10] sm:$0xff] %v367_v60  ;;  %993 = vst [vmem:[%s1625_s29 + $0x18] sm:$0xff] %v785_v61 }
 0x122   : > { %1204 = shalt.err (!%p1201_p2)
}
 0x123   : > { %s1205_s17 = scalar_lea.hbm %s1672_s6, 1024  ;;  %s1209_s23 = scalar_lea.hbm %s1723_s2, 2048 }
 0x124   : > { %p1206_p3 = scmp.ne.s32.totalorder %s1672_s6, %s1205_s17  ;;  %p1210_p8 = scmp.lt.s32.totalorder %s1672_s6, %s1723_s2 }
 0x125   : > { %p1211_p9 = scmp.lt.s32.totalorder %s1209_s23, %s1205_s17 }
 0x126   : > { %p1207_p4 = pnand %p1206_p3, %p1316_p5 }
 0x127   : > { %p1212_p10 = por %p1211_p9, %p1210_p8 }
 0x128   : > { %p1208_p7 = pneg %p1207_p4 }
 0x12a   : > { %p1213_p11 = pnand %p1212_p10, %p1208_p7 }
 0x12c   : > { %1216 = shalt.err (!%p1213_p11)
}
 0x12d   : > { %s1261_s26 = smov 256   ;;  %s1262_s27 = smov 16  }
 0x12e   : > { %1125 = dma.vmem_to_hbm [thread:$0]  (%p1316_p5), %s1674_s3, 1024, %s1672_s6, %s1681_s7, %s1261_s26, %s1261_s26, %s1262_s27  }
 0x12f PF: > { %p1131_p12 = scmp.ge.s32.totalorder %s1251_s12, 2  ;;  %s1026_s28 = sand.u32 1, %s1239_s9  }
 0x130   : > { %s1027_s29 = scalar_lea.sflag [#allocation3], %s1026_s28 }
 0x131   : > { %p1128_p13 = pnand %p1131_p12, %p1320_p6 }
 0x133   : > { %p1129_p0 = pneg %p1128_p13 }
 0x135   : > { %1234 = dma.done.wait (%p1129_p0), %s1027_s29, 1024  }
 0x136   : > { %1236 = vsyncadd (%p1129_p0), %s1027_s29, 4294966272  ;;  %p12_p1 = scmp.ge.s32.totalorder %s1303_s15, 4   ;;  %s1730_s9 = smov %s1243_s10 }
 0x137   : > { %s1731_s10 = smov %s1247_s11  ;;  %s1732_s11 = smov %s1314_s18 }
 0x138   : > { %s1733_s12 = smov %s1303_s15  ;;  %14 = sbr.rel (!%p12_p1) target bundleno = 3 (0x3), region = 61 }
 0x13d   :  { %1032 = vsyncpa [#allocation3], 1 }
 0x13e   :  { %1034 = vsyncpa [#allocation3 + $0x1], 1 }

</bundles_post_ra>
